<compile_context>
chip_gen: v5e
topology: v5e:2x2
jax: 0.10.0
libtpu: 0.0.40
codegen_flags: <defaults>
</compile_context>

<pallas_src>
import math

import jax
import jax.numpy as jnp
from jax.experimental import pallas as pl
from jax.experimental.pallas import tpu as pltpu

INPUT_SIZE = 6
HIDDEN_SIZE = 6
NUM_CLASSES = 21

LANE = 128              # TPU lane width; hidden/class dims padded to this.
K_PAD = 8               # contraction dim padded to one sublane group (f32).
DEFAULT_BLOCK_B = 512   # default batch-row tile (multiple of 8 for f32).


def _round_up(x, m):
    return ((x + m - 1) // m) * m


def _pad_to(a, shape):
    pads = [(0, s - d) for d, s in zip(a.shape, shape)]
    return jnp.pad(a, pads)


def mlp_kernel(x_ref, w1_ref, b1_ref, w2_ref, b2_ref, o_ref):
    # fc1 on the MXU: (TB, K_PAD) @ (K_PAD, 128), f32 accumulation.
    h = jnp.dot(x_ref[...], w1_ref[...], preferred_element_type=jnp.float32)
    # Bias add + ReLU epilogue on the VPU (padded hidden lanes stay 0).
    h = jnp.maximum(h + b1_ref[...], 0.0)          # (TB, 128) + (1, 128)
    # fc2 on the MXU: (TB, 128) @ (128, 128), f32 accumulation.
    out = jnp.dot(h, w2_ref[...], preferred_element_type=jnp.float32)
    o_ref[...] = (out + b2_ref[...]).astype(o_ref.dtype)


def mlp_forward(x, w1, b1, w2, b2, *, block_b=DEFAULT_BLOCK_B):
    """x: (B, INPUT_SIZE) f32; w1: (INPUT_SIZE, HIDDEN_SIZE);
    b1: (1, HIDDEN_SIZE); w2: (HIDDEN_SIZE, NUM_CLASSES); b2: (1, NUM_CLASSES).
    Returns (B, NUM_CLASSES) in x.dtype."""
    B = x.shape[0]

    # Batch tile: multiple of 8 (f32 sublane packing), capped by block_b.
    tb = min(_round_up(block_b, 8), _round_up(B, 8))
    Bp = _round_up(B, tb)
    grid_b = Bp // tb

    # Zero padding is exact: padded input cols / weight rows contribute 0,
    # padded hidden units are relu(0 + 0) = 0, padded class columns are sliced
    # off below.  x keeps its narrow natural width (only rows + 6->8 cols).
    xp = _pad_to(x.astype(jnp.float32), (Bp, K_PAD))
    w1p = _pad_to(w1.astype(jnp.float32), (K_PAD, LANE))
    b1p = _pad_to(b1.astype(jnp.float32), (1, LANE))
    w2p = _pad_to(w2.astype(jnp.float32), (LANE, LANE))
    b2p = _pad_to(b2.astype(jnp.float32), (1, LANE))

    out_padded = pl.pallas_call(
        mlp_kernel,
        out_shape=jax.ShapeDtypeStruct((Bp, LANE), jnp.float32),
        grid=(grid_b,),
        in_specs=[
            pl.BlockSpec((tb, K_PAD), lambda i: (i, 0)),     # x tile
            pl.BlockSpec((K_PAD, LANE), lambda i: (0, 0)),   # W1, resident
            pl.BlockSpec((1, LANE), lambda i: (0, 0)),       # b1, resident
            pl.BlockSpec((LANE, LANE), lambda i: (0, 0)),    # W2, resident
            pl.BlockSpec((1, LANE), lambda i: (0, 0)),       # b2, resident
        ],
        out_specs=pl.BlockSpec((tb, LANE), lambda i: (i, 0)),
        compiler_params=pltpu.CompilerParams(
            dimension_semantics=("parallel",)),
    )(xp, w1p, b1p, w2p, b2p)

    return out_padded[:B, :NUM_CLASSES].astype(x.dtype)


def init_params(key):
    """Deterministic init mimicking nn.Linear's default U(-1/sqrt(fan_in), +).
    Weights stored transposed as (in, out) so the kernel does plain x @ W."""
    k1, k2, k3, k4 = jax.random.split(key, 4)
    bound1 = 1.0 / math.sqrt(INPUT_SIZE)
    bound2 = 1.0 / math.sqrt(HIDDEN_SIZE)
    w1 = jax.random.uniform(k1, (INPUT_SIZE, HIDDEN_SIZE), jnp.float32,
                            minval=-bound1, maxval=bound1)
    b1 = jax.random.uniform(k2, (1, HIDDEN_SIZE), jnp.float32,
                            minval=-bound1, maxval=bound1)
    w2 = jax.random.uniform(k3, (HIDDEN_SIZE, NUM_CLASSES), jnp.float32,
                            minval=-bound2, maxval=bound2)
    b2 = jax.random.uniform(k4, (1, NUM_CLASSES), jnp.float32,
                            minval=-bound2, maxval=bound2)
    return w1, b1, w2, b2


if __name__ == "__main__":
    key = jax.random.PRNGKey(0)
    k_params, k_x = jax.random.split(key)
    w1, b1, w2, b2 = init_params(k_params)

    B = 40
    x = jax.random.normal(k_x, (B, INPUT_SIZE), jnp.float32)

    # Full-f32 reference (original module semantics).
    ref = jnp.maximum(
        jnp.dot(x, w1, precision=jax.lax.Precision.HIGHEST) + b1, 0.0)
    ref = jnp.dot(ref, w2, precision=jax.lax.Precision.HIGHEST) + b2

    # Multi-tile path: block_b=16 -> Bp=48 -> 3 batch tiles.
    out_small = jax.block_until_ready(mlp_forward(x, w1, b1, w2, b2, block_b=16))
    assert out_small.shape == (B, NUM_CLASSES)
    assert jnp.allclose(out_small, ref, atol=5e-2, rtol=5e-2)

    # Single-tile path with the default (large) block.
    out_big = jax.block_until_ready(mlp_forward(x, w1, b1, w2, b2))
    assert out_big.shape == (B, NUM_CLASSES)
    assert jnp.allclose(out_big, ref, atol=5e-2, rtol=5e-2)

    print("KERNEL_OK")
</pallas_src>

<mosaic_0001>
module attributes {stable_mosaic.version = 11 : i64} {
  func.func @mlp_kernel(%arg0: i32, %arg1: memref<16x8xf32, #tpu.memory_space<vmem>>, %arg2: memref<8x128xf32, #tpu.memory_space<vmem>>, %arg3: memref<1x128xf32, #tpu.memory_space<vmem>>, %arg4: memref<128x128xf32, #tpu.memory_space<vmem>>, %arg5: memref<1x128xf32, #tpu.memory_space<vmem>>, %arg6: memref<16x128xf32, #tpu.memory_space<vmem>>) attributes {dimension_semantics = [#tpu.dimension_semantics<parallel>], iteration_bounds = array<i64: 3>, scalar_prefetch = 0 : i64, scratch_operands = 0 : i64, tpu.core_type = #tpu.core_type<tc>, window_params = [{transform_indices = @transform_0, window_bounds = array<i64: 16, 8>}, {pipeline_mode = #tpu.pipeline_mode<synchronous>, transform_indices = @transform_1, window_bounds = array<i64: 8, 128>}, {pipeline_mode = #tpu.pipeline_mode<synchronous>, transform_indices = @transform_2, window_bounds = array<i64: 1, 128>}, {pipeline_mode = #tpu.pipeline_mode<synchronous>, transform_indices = @transform_3, window_bounds = array<i64: 128, 128>}, {pipeline_mode = #tpu.pipeline_mode<synchronous>, transform_indices = @transform_4, window_bounds = array<i64: 1, 128>}, {transform_indices = @transform_5, window_bounds = array<i64: 16, 128>}]} {
    %c0 = arith.constant 0 : index
    %c0_0 = arith.constant 0 : index
    %0 = vector.load %arg1[%c0, %c0_0] : memref<16x8xf32, #tpu.memory_space<vmem>>, vector<16x8xf32>
    %c0_1 = arith.constant 0 : index
    %c0_2 = arith.constant 0 : index
    %1 = vector.load %arg2[%c0_1, %c0_2] : memref<8x128xf32, #tpu.memory_space<vmem>>, vector<8x128xf32>
    %cst = arith.constant dense<0.000000e+00> : vector<16x128xf32>
    %2 = tpu.matmul %0, %1, %cst {dimension_numbers = #tpu.dot_dimension_numbers<[1], [0], [0], [1], [0, 0, 1, 1], [], []>} : vector<16x8xf32>, vector<8x128xf32>, vector<16x128xf32> -> vector<16x128xf32>
    %c0_3 = arith.constant 0 : index
    %c0_4 = arith.constant 0 : index
    %3 = vector.load %arg3[%c0_3, %c0_4] : memref<1x128xf32, #tpu.memory_space<vmem>>, vector<1x128xf32>
    %4 = vector.broadcast %3 : vector<1x128xf32> to vector<16x128xf32>
    %5 = arith.addf %2, %4 : vector<16x128xf32>
    %cst_5 = arith.constant 0.000000e+00 : f32
    %6 = vector.broadcast %cst_5 : f32 to vector<16x128xf32>
    %7 = arith.maximumf %5, %6 : vector<16x128xf32>
    %c0_6 = arith.constant 0 : index
    %c0_7 = arith.constant 0 : index
    %8 = vector.load %arg4[%c0_6, %c0_7] : memref<128x128xf32, #tpu.memory_space<vmem>>, vector<128x128xf32>
    %cst_8 = arith.constant dense<0.000000e+00> : vector<16x128xf32>
    %9 = tpu.matmul %7, %8, %cst_8 {dimension_numbers = #tpu.dot_dimension_numbers<[1], [0], [0], [1], [0, 0, 1, 1], [], []>} : vector<16x128xf32>, vector<128x128xf32>, vector<16x128xf32> -> vector<16x128xf32>
    %c0_9 = arith.constant 0 : index
    %c0_10 = arith.constant 0 : index
    %10 = vector.load %arg5[%c0_9, %c0_10] : memref<1x128xf32, #tpu.memory_space<vmem>>, vector<1x128xf32>
    %11 = vector.broadcast %10 : vector<1x128xf32> to vector<16x128xf32>
    %12 = arith.addf %9, %11 : vector<16x128xf32>
    %c0_11 = arith.constant 0 : index
    %c0_12 = arith.constant 0 : index
    %13 = vector.load %arg6[%c0_11, %c0_12] : memref<16x128xf32, #tpu.memory_space<vmem>>, vector<16x128xf32>
    tpu.vector_store %arg6[%c0_11, %c0_12], %12 {strides = array<i32>} : memref<16x128xf32, #tpu.memory_space<vmem>>, vector<16x128xf32>,
    return
  }
  func.func @transform_0(%arg0: i32) -> (i32, i32) {
    %c0_i32 = arith.constant 0 : i32
    %c0_i32_0 = arith.constant 0 : i32
    return %arg0, %c0_i32 : i32, i32
  }
  func.func @transform_1(%arg0: i32) -> (i32, i32) {
    %c0_i32 = arith.constant 0 : i32
    %c0_i32_0 = arith.constant 0 : i32
    %c0_i32_1 = arith.constant 0 : i32
    return %c0_i32, %c0_i32_0 : i32, i32
  }
  func.func @transform_2(%arg0: i32) -> (i32, i32) {
    %c0_i32 = arith.constant 0 : i32
    %c0_i32_0 = arith.constant 0 : i32
    %c0_i32_1 = arith.constant 0 : i32
    return %c0_i32, %c0_i32_0 : i32, i32
  }
  func.func @transform_3(%arg0: i32) -> (i32, i32) {
    %c0_i32 = arith.constant 0 : i32
    %c0_i32_0 = arith.constant 0 : i32
    %c0_i32_1 = arith.constant 0 : i32
    return %c0_i32, %c0_i32_0 : i32, i32
  }
  func.func @transform_4(%arg0: i32) -> (i32, i32) {
    %c0_i32 = arith.constant 0 : i32
    %c0_i32_0 = arith.constant 0 : i32
    %c0_i32_1 = arith.constant 0 : i32
    return %c0_i32, %c0_i32_0 : i32, i32
  }
  func.func @transform_5(%arg0: i32) -> (i32, i32) {
    %c0_i32 = arith.constant 0 : i32
    %c0_i32_0 = arith.constant 0 : i32
    return %arg0, %c0_i32 : i32, i32
  }
}

</mosaic_0001>

<bundles_post_ra>
// kernel: tpu_custom_call.1
= control target key start
LH: loop header
LB: loop body
LE: loop exit
PB: predicated region body
PF: predicated region fallthrough
CT: control target
= control target key end

     0   :  { %10 = vsyncpa [#allocation3], 0  ;;  %s744_s0 = inlined_call_operand.vmem [shape: f32[48,8], index: 0, kind: input, shape index: {}]   ;;  %s745_s1 = inlined_call_operand.vmem [shape: f32[8,128], index: 1, kind: input, shape index: {}]   ;;  %s746_s2 = inlined_call_operand.vmem [shape: f32[1,128], index: 2, kind: input, shape index: {}]   ;;  %s747_s3 = inlined_call_operand.hbm [shape: f32[128,128], index: 3, kind: input, shape index: {}]   ;;  %s748_s4 = inlined_call_operand.vmem [shape: f32[1,128], index: 4, kind: input, shape index: {}]   ;;  %s749_s5 = inlined_call_operand.hbm [shape: f32[48,128], index: 5, kind: output, shape index: {}]  }
   0x1   :  { %11 = vsyncpa [#allocation4], 0 }
   0x2   :  { %13 = vsyncpa [#allocation4 + $0x1], 0  ;;  %s639_s18 = smov 0   ;;  %s641_s19 = smov 0  }
   0x3   :  { %s643_s20 = smov 0   ;;  %s645_s21 = smov 0  }
   0x4 LB: > { %s660_s22 = sadd.s32 4294967295, %s602_s21   ;;  %s417_s23 = sadd.s32 4294967294, %s602_s21   ;;  %s602_s21 = sphi %s645_s21, %s755_s21   ;;  %s598_s20 = sphi %s643_s20, %s754_s20   ;;  %s594_s19 = sphi %s641_s19, %s753_s19   ;;  %s590_s18 = sphi %s639_s18, %s752_s18  }
   0x5   : > { %s664_s24 = sadd.s32 1, %s602_s21   ;;  %s136_s25 = sadd.s32 1, %s598_s20 }
   0x6   : > { %s133_s26 = ssub.s32 %s602_s21, %s664_s24  ;;  %p146_p0 = scmp.ne.s32.totalorder %s598_s20, %s594_s19 }
   0x7   : > { %p134_p1 = scmp.eq.s32.totalorder %s133_s26, 0  ;;  %p147_p2 = scmp.eq.s32.totalorder %s660_s22, 2 }
   0x8   : > { %p152_p3 = scmp.ne.s32.totalorder %s594_s19, %s590_s18  ;;  %p153_p4 = scmp.eq.s32.totalorder %s417_s23, 2 }
   0x9   : > { %s675_s27 = scalar_select %p134_p1, %s598_s20, %s136_s25  }
   0xa   : > { %p677_p5 = por %p147_p2, %p146_p0  ;;  %p681_p6 = por %p153_p4, %p152_p3 }
   0xb   : > { %p418_p7 = scmp.ge.s32.totalorder %s602_s21, 1  ;;  %p160_p8 = scmp.lt.s32.totalorder %s602_s21, 4 }
   0xc   : > { %p464_p9 = scmp.eq.s32.totalorder %s660_s22, 0  ;;  %s177_s7 = sshll.u32 %s747_s3, 4  ;;  %s178_s7 = int_to_ptr.hbm [resolvable:$true] %s177_s7 }
   0xd   : > { %p161_p10 = pnand %p418_p7, %p160_p8  ;;  %s604_s8 = smov [#allocation2]  }
   0xe   : > { %s179_s9 = sshll.u32 %s604_s8, 4  ;;  %s605_s10 = smov 128   ;;  %s180_s9 = int_to_ptr.vmem [resolvable:$true] %s179_s9 }
   0xf   : > { %p456_p11 = pneg %p161_p10  ;;  %s606_s11 = smov 8  }
  0x10   : > { %207 = sbr.rel (%p161_p10) target bundleno = 305 (0x131), region = 40 }
  0x11   : > { %p457_p12 = pnand %p464_p9, %p456_p11 }
  0x13   : > { %459 = dma.hbm_to_vmem [thread:$0]  (!%p457_p12), %s178_s7, 2048, %s180_s9, [#allocation3], %s605_s10, %s605_s10, %s606_s11  }
  0x15   : > { %581 = dma.done.wait (%p464_p9), [#allocation3], 2048  }
  0x16   : > { %583 = vsyncadd (%p464_p9), [#allocation3], 4294965248  ;;  %s424_s12 = sshll.u32 %s660_s22, 1  ;;  %vm250_vm0 = vcmask 64512   ;;  %v245_v0 = vld [vmem:[%s745_s1] sm:$0xff]  ;;  %v297_v2 = vld [vmem:[#allocation2 + $0x78] sm:$0xff] }
  0x17   : > { %p237_p13 = scmp.lt.s32.totalorder %s424_s12, 5  ;;  %272 = vmatpush.msra.mxu0 %v245_v0  ;;  %v296_v3 = vld [vmem:[#allocation2 + $0x70] sm:$0xff]  ;;  %302 = vmatpush.msra.mxu1 %v297_v2  ;;  %v295_v4 = vld [vmem:[#allocation2 + $0x68] sm:$0xff]  ;;  %v294_v5 = vld [vmem:[#allocation2 + $0x60] sm:$0xff]  ;;  %s233_s30 = sand.u32 1, %s594_s19  }
  0x18   : > { %434 = vmatpush.msra.mxu2 %v297_v2  ;;  %v293_v7 = vld [vmem:[#allocation2 + $0x58] sm:$0xff]  ;;  %v292_v8 = vld [vmem:[#allocation2 + $0x50] sm:$0xff]  ;;  %v291_v9 = vld [vmem:[#allocation2 + $0x48] sm:$0xff]  ;;  %s423_s6 = sshll.u32 %s233_s30, 4  ;;  %s433_s10 = sshll.u32 %s660_s22, 4 }
  0x19   : > { %s757_s12 = smov (!%p237_p13, %s424_s12), 5  ;;  %303 = vmatpush.msra.mxu1 %v296_v3  ;;  %v290_v10 = vld [vmem:[#allocation2 + $0x40] sm:$0xff]  ;;  %v289_v11 = vld [vmem:[#allocation2 + $0x38] sm:$0xff]  ;;  %v288_v12 = vld [vmem:[#allocation2 + $0x30] sm:$0xff]  ;;  %s235_s9 = scalar_lea.vmem [#allocation5], %s423_s6 }
  0x1a   : > { %s425_s13 = sshll.u32 %s757_s12, 3  ;;  %435 = vmatpush.msra.mxu2 %v296_v3  ;;  %v287_v13 = vld [vmem:[#allocation2 + $0x28] sm:$0xff]  ;;  %v286_v14 = vld [vmem:[#allocation2 + $0x20] sm:$0xff]  ;;  %v285_v15 = vld [vmem:[#allocation2 + $0x18] sm:$0xff]  ;;  %s340_s14 = sshll.u32 %s235_s9, 4  ;;  %s341_s14 = int_to_ptr.vmem [resolvable:$true] %s340_s14 }
  0x1b   : > { %s240_s16 = scalar_lea.vmem %s744_s0, %s425_s13  ;;  %304 = vmatpush.msra.mxu1 %v295_v4  ;;  %v284_v16 = vld [vmem:[#allocation2 + $0x10] sm:$0xff]  ;;  %v283_v17 = vld [vmem:[#allocation2 + $0x8] sm:$0xff]  ;;  %v282_v18 = vld [vmem:[#allocation2] sm:$0xff]  ;;  %s339_s13 = scalar_lea.hbm %s749_s5, %s433_s10 }
  0x1c   : > { %v243_v1 = vld [vmem:[%s240_s16] sm:$0xff]  ;;  %v244_v6 = vld [vmem:[%s240_s16 + $0x8] sm:$0xff]  ;;  %436 = vmatpush.msra.mxu2 %v295_v4  ;;  %s342_s15 = sshll.u32 %s339_s13, 4  ;;  %s328_s16 = scalar_lea.sflag [#allocation4], %s233_s30  ;;  %s343_s15 = int_to_ptr.hbm [resolvable:$true] %s342_s15 }
  0x1d   : > { %426 = vmatmul.msk.f32.vlgmr.msra.gmra.mxu0 %vm250_vm0, %v243_v1  ;;  %305 = vmatpush.msra.mxu1 %v294_v5  ;;  %v504_v19 = vld [vmem:[%s746_s2] ss:$0 sm:$0xff]  ;;  %s550_s17 = sshra.s32 %s343_s15, 4  ;;  %s556_s26 = scalar_lea.hbm %s749_s5, 48  ;;  %s551_s17 = int_to_ptr.hbm [resolvable:$true] %s550_s17 }
  0x1e   : > { %437 = vmatpush.msra.mxu2 %v294_v5  ;;  %v505_v26 = vld [vmem:[%s748_s4] ss:$0 sm:$0xff]  ;;  %s552_s23 = scalar_lea.hbm %s551_s17, 16  ;;  %p557_p3 = scmp.lt.s32.totalorder %s551_s17, %s749_s5 }
  0x1f   : > { %306 = vmatpush.msra.mxu1 %v293_v7  ;;  %p553_p0 = scmp.ne.s32.totalorder %s551_s17, %s552_s23  ;;  %p558_p4 = scmp.lt.s32.totalorder %s556_s26, %s552_s23 }
  0x20   : > { %438 = vmatpush.msra.mxu2 %v293_v7 }
  0x21   : > { %307 = vmatpush.msra.mxu1 %v292_v8  ;;  %p554_p1 = pnand %p553_p0, %p677_p5  ;;  %p559_p7 = por %p558_p4, %p557_p3 }
  0x22   : > { %439 = vmatpush.msra.mxu2 %v292_v8 }
  0x23   : > { %308 = vmatpush.msra.mxu1 %v291_v9  ;;  %p555_p2 = pneg %p554_p1 }
  0x24   : > { %440 = vmatpush.msra.mxu2 %v291_v9 }
  0x25   : > { %427 = vmatmul.msk.f32.gmra.mxu0 %vm250_vm0, %v244_v6  ;;  %309 = vmatpush.msra.mxu1 %v290_v10  ;;  %p560_p8 = pnand %p559_p7, %p555_p2 }
  0x26   : > { %441 = vmatpush.msra.mxu2 %v290_v10 }
  0x27   : > { %310 = vmatpush.msra.mxu1 %v289_v11 }
  0x28   : > { %442 = vmatpush.msra.mxu2 %v289_v11 }
  0x29   : > { %311 = vmatpush.msra.mxu1 %v288_v12 }
  0x2a   : > { %443 = vmatpush.msra.mxu2 %v288_v12 }
  0x2b   : > { %312 = vmatpush.msra.mxu1 %v287_v13 }
  0x2c   : > { %444 = vmatpush.msra.mxu2 %v287_v13 }
  0x2d   : > { %313 = vmatpush.msra.mxu1 %v286_v14 }
  0x2e   : > { %445 = vmatpush.msra.mxu2 %v286_v14 }
  0x2f   : > { %314 = vmatpush.msra.mxu1 %v285_v15 }
  0x30   : > { %446 = vmatpush.msra.mxu2 %v285_v15 }
  0x31   : > { %315 = vmatpush.msra.mxu1 %v284_v16 }
  0x32   : > { %447 = vmatpush.msra.mxu2 %v284_v16 }
  0x33   : > { %316 = vmatpush.msra.mxu1 %v283_v17 }
  0x34   : > { %448 = vmatpush.msra.mxu2 %v283_v17 }
  0x35   : > { %317 = vmatpush.msra.mxu1 %v282_v18 }
  0x36   : > { %449 = vmatpush.msra.mxu2 %v282_v18 }
  0x9a   : > { %v274_v20 = vpop.f32.mrf.mxu0 }
  0x9b   : > { %v275_v21 = vadd.f32 %v504_v19, %v274_v20 }
  0x9d   : > { %v280_v22 = vmax.f32 %v275_v21, 0.0 }
  0x9f   : > { %318 = vmatmul.f32.vlgmr.msra.gmra.mxu1 %v280_v22 }
  0xa2   : > { %v277_v23 = vpop.f32.mrf.mxu0 }
  0xa3   : > { %v278_v24 = vadd.f32 %v504_v19, %v277_v23 }
  0xa5   : > { %v281_v25 = vmax.f32 %v278_v24, 0.0 }
  0xa7   : > { %321 = vmatmul.f32.vlgmr.msra.gmra.mxu2 %v281_v25 }
 0x11c   : > { %v319_v27 = vpop.f32.mrf.mxu1 }
 0x11d   : > { %v320_v28 = vadd.f32 %v505_v26, %v319_v27 }
 0x11f   : > { %325 = vst [vmem:[%s235_s9] sm:$0xff] %v320_v28 }
 0x12a   : > { %v322_v29 = vpop.f32.mrf.mxu2 }
 0x12b   : > { %v323_v30 = vadd.f32 %v505_v26, %v322_v29 }
 0x12d   : > { %326 = vst [vmem:[%s235_s9 + $0x8] sm:$0xff] %v323_v30 }
 0x12e   : > { %563 = shalt.err (!%p560_p8)
}
 0x12f   : > { %s607_s30 = smov 128   ;;  %s608_s8 = smov 8  }
 0x130   : > { %454 = dma.vmem_to_hbm [thread:$0]  (%p677_p5), %s341_s14, 256, %s343_s15, %s328_s16, %s607_s30, %s607_s30, %s608_s8  }
 0x131 PF: > { %p466_p9 = scmp.ge.s32.totalorder %s602_s21, 2  ;;  %s357_s9 = sand.u32 1, %s590_s18  }
 0x132   : > { %s358_s10 = scalar_lea.sflag [#allocation4], %s357_s9 }
 0x133   : > { %p461_p10 = pnand %p466_p9, %p681_p6 }
 0x135   : > { %p462_p11 = pneg %p461_p10 }
 0x137   : > { %585 = dma.done.wait (%p462_p11), %s358_s10, 256  }
 0x138   : > { %587 = vsyncadd (%p462_p11), %s358_s10, 4294967040  ;;  %p16_p12 = scmp.ge.s32.totalorder %s664_s24, 5   ;;  %s752_s18 = smov %s594_s19 }
 0x139   : > { %s753_s19 = smov %s598_s20  ;;  %s754_s20 = smov %s675_s27 }
 0x13a   : > { %s755_s21 = smov %s664_s24  ;;  %18 = sbr.rel (!%p16_p12) target bundleno = 4 (0x4), region = 80 }
 0x13f   :  { %364 = vsyncpa [#allocation3], 1 }
 0x140   :  { %366 = vsyncpa [#allocation3 + $0x1], 1 }
 0x141   :  { %367 = vsyncpa [#allocation4], 1 }
 0x142   :  { %369 = vsyncpa [#allocation4 + $0x1], 1 }

</bundles_post_ra>
